<compile_context>
chip_gen: v6e
topology: v6e:2x2x1
jax: 0.10.0
libtpu: 0.0.40
codegen_flags: <defaults>
</compile_context>

<pallas_src>
import jax
import jax.numpy as jnp
from jax.experimental import pallas as pl
from jax.experimental.pallas import tpu as pltpu

COEFF = 12.0

# ~4 MiB per block: double-buffered in+out = 16 MiB of VMEM, within the
# 32 MiB scoped limit we request below on every chip generation.
_TARGET_BLOCK_BYTES = 4 * 1024 * 1024
_VMEM_LIMIT_BYTES = 32 * 1024 * 1024   # v5e's scoped default is 16 MiB -> raise it
_MIN_PALLAS_BYTES = 256 * 1024         # below this, plain JAX (fusion / launch overhead)


def _softgate_kernel(x_ref, o_ref):
    x = x_ref[...]
    # Compute in f32 for accuracy on narrow inputs; compute is never the
    # bottleneck here, HBM traffic is.
    xf = x if x.dtype == jnp.float32 else x.astype(jnp.float32)
    # 12*sigmoid(x) == 6*tanh(x/2) + 6 : single EUP op + VPU FMA (VPU has slack)
    # instead of exp + reciprocal (2 EUP ops) -> stays HBM-bound on v7x bf16/fp8.
    y = 6.0 * jnp.tanh(0.5 * xf) + 6.0
    o_ref[...] = y.astype(o_ref.dtype)


def _pick_tile(n_rows: int, n_cols: int, itemsize: int) -> int:
    """Rows per block: ~4 MiB footprint, 32-row aligned (f32/bf16/int8 packing)."""
    rows = max(1, _TARGET_BLOCK_BYTES // (n_cols * itemsize))
    rows = max(32, (rows // 32) * 32)
    if rows >= n_rows:
        return n_rows  # full-extent block: exempt from (8,128)/packing rules
    return rows


def _softgate_2d(x2d: jax.Array, tile: int, donate: bool) -> jax.Array:
    n_rows, n_cols = x2d.shape
    n = n_rows * n_cols
    itemsize = jnp.dtype(x2d.dtype).itemsize
    grid = (pl.cdiv(n_rows, tile),)  # last partial row-block is auto-masked
    extra = {"input_output_aliases": {0: 0}} if donate else {}
    return pl.pallas_call(
        _softgate_kernel,
        out_shape=jax.ShapeDtypeStruct((n_rows, n_cols), x2d.dtype),
        grid_spec=pltpu.PrefetchScalarGridSpec(
            num_scalar_prefetch=0,
            grid=grid,
            in_specs=[pl.BlockSpec((tile, n_cols), lambda i: (i, 0))],
            out_specs=pl.BlockSpec((tile, n_cols), lambda i: (i, 0)),
        ),
        compiler_params=pltpu.CompilerParams(
            dimension_semantics=("parallel",),     # v7x: shard grid over 2 TCs
            vmem_limit_bytes=_VMEM_LIMIT_BYTES,    # v5e: default 16 MiB is too tight
        ),
        cost_estimate=pl.CostEstimate(
            flops=3 * n,                 # mul, tanh-surrounding FMA, cast-ish
            transcendentals=n,           # one tanh per element
            bytes_accessed=2 * n * itemsize,
        ),
        **extra,
    )(x2d)


def soft_gate(x: jax.Array, *, donate: bool = False,
              min_pallas_bytes: int = _MIN_PALLAS_BYTES) -> jax.Array:
    """sigmoid(x) * 12.0 elementwise; Pallas TPU kernel on the main path.

    Accepts any shape (e.g. NCHW); semantics match the PyTorch SoftGate.
    donate=True writes in place via input_output_aliases (footprint only --
    every byte is still read and written once, so no bandwidth saving).
    """
    orig_shape = x.shape
    n = x.size
    if n == 0:
        return x
    itemsize = jnp.dtype(x.dtype).itemsize

    # Small-tensor / fusion escape hatch: let XLA fuse with neighbours instead
    # of paying a dedicated HBM round trip + custom-call launch.
    if n * itemsize < min_pallas_bytes:
        return (jax.nn.sigmoid(x) * COEFF).astype(x.dtype)

    # Main path: element count divides a lane-dense width -> zero-copy
    # reshape, no padding, no output slice, full-width contiguous DMAs.
    for n_cols in (1024, 512, 256, 128):
        if n % n_cols == 0:
            x2d = x.reshape(n // n_cols, n_cols)
            tile = _pick_tile(x2d.shape[0], n_cols, itemsize)
            return _softgate_2d(x2d, tile, donate).reshape(orig_shape)

    # Ragged fallback (n % 128 != 0, rare): plain JAX.  One fused read+write
    # pass is already at the HBM roofline for this op; the old pad+kernel+slice
    # route cost ~3x the traffic.
    return (jax.nn.sigmoid(x) * COEFF).astype(x.dtype)


if __name__ == "__main__":
    key = jax.random.PRNGKey(0)
    # NCHW input, as in the PyTorch module's usage context.
    x = jax.random.normal(key, (2, 4, 16, 16), dtype=jnp.float32)

    # Force the Pallas path even at this small test size.
    y = jax.block_until_ready(soft_gate(x, min_pallas_bytes=0))

    # Reference (plain JAX) -- same semantics as torch.sigmoid(x).mul(12.0).
    # tanh-form is algebraically identical but not bit-identical -> allclose.
    y_ref = jax.nn.sigmoid(x) * COEFF
    assert y.shape == x.shape and y.dtype == x.dtype
    assert jnp.allclose(y, y_ref, atol=1e-4, rtol=1e-5)

    # Also exercise the small/ragged escape hatch (plain JAX, no kernel launch).
    x_ragged = jax.random.normal(jax.random.PRNGKey(1), (3, 5, 7), dtype=jnp.float32)
    y_ragged = jax.block_until_ready(soft_gate(x_ragged))
    assert jnp.allclose(y_ragged, jax.nn.sigmoid(x_ragged) * COEFF,
                        atol=1e-4, rtol=1e-5)

    print("KERNEL_OK")
</pallas_src>

<mosaic_0001>
module attributes {stable_mosaic.version = 11 : i64} {
  func.func @_softgate_kernel(%arg0: i32, %arg1: memref<2x1024xf32, #tpu.memory_space<vmem>>, %arg2: memref<2x1024xf32, #tpu.memory_space<vmem>>) attributes {dimension_semantics = [#tpu.dimension_semantics<parallel>], iteration_bounds = array<i64: 1>, scalar_prefetch = 0 : i64, scratch_operands = 0 : i64, tpu.core_type = #tpu.core_type<tc>, window_params = [{transform_indices = @transform_0, window_bounds = array<i64: 2, 1024>}, {transform_indices = @transform_1, window_bounds = array<i64: 2, 1024>}]} {
    %c0 = arith.constant 0 : index
    %c0_0 = arith.constant 0 : index
    %0 = vector.load %arg1[%c0, %c0_0] : memref<2x1024xf32, #tpu.memory_space<vmem>>, vector<2x1024xf32>
    %cst = arith.constant 5.000000e-01 : f32
    %1 = vector.broadcast %cst : f32 to vector<2x1024xf32>
    %2 = arith.mulf %1, %0 : vector<2x1024xf32>
    %3 = math.tanh %2 : vector<2x1024xf32>
    %cst_1 = arith.constant 6.000000e+00 : f32
    %4 = vector.broadcast %cst_1 : f32 to vector<2x1024xf32>
    %5 = arith.mulf %4, %3 : vector<2x1024xf32>
    %cst_2 = arith.constant 6.000000e+00 : f32
    %6 = vector.broadcast %cst_2 : f32 to vector<2x1024xf32>
    %7 = arith.addf %5, %6 : vector<2x1024xf32>
    %c0_3 = arith.constant 0 : index
    %c0_4 = arith.constant 0 : index
    %8 = vector.load %arg2[%c0_3, %c0_4] : memref<2x1024xf32, #tpu.memory_space<vmem>>, vector<2x1024xf32>
    tpu.vector_store %arg2[%c0_3, %c0_4], %7 {strides = array<i32>} : memref<2x1024xf32, #tpu.memory_space<vmem>>, vector<2x1024xf32>,
    return
  }
  func.func @transform_0(%arg0: i32) -> (i32, i32) {
    %c0_i32 = arith.constant 0 : i32
    %c0_i32_0 = arith.constant 0 : i32
    return %arg0, %c0_i32 : i32, i32
  }
  func.func @transform_1(%arg0: i32) -> (i32, i32) {
    %c0_i32 = arith.constant 0 : i32
    %c0_i32_0 = arith.constant 0 : i32
    return %arg0, %c0_i32 : i32, i32
  }
}

</mosaic_0001>

<bundles_post_ra>
// kernel: tpu_custom_call.1
= control target key start
LH: loop header
LB: loop body
LE: loop exit
PB: predicated region body
PF: predicated region fallthrough
CT: control target
= control target key end

     0   :  { %6 = vsyncpa [#allocation3], 0  ;;  %s116_s0 = inlined_call_operand.hbm [shape: f32[2,1024], index: 0, kind: input, shape index: {}]   ;;  %s117_s1 = inlined_call_operand.hbm [shape: f32[2,1024], index: 1, kind: output, shape index: {}]  }
   0x1   :  { %7 = vsyncpa [#allocation4], 0  ;;  %s98_s6 = smov [#allocation2]  }
   0x2   :  { %s14_s7 = sshll.u32 %s98_s6, 4  ;;  %s15_s7 = int_to_ptr.vmem [resolvable:$true] %s14_s7 }
   0x3   :  { %s62_s8 = scalar_lea.vmem %s15_s7, 256  ;;  %p67_p1 = scmp.lt.s32.totalorder %s15_s7, %s15_s7 }
   0x4   :  { %p63_p0 = scmp.ne.s32.totalorder %s15_s7, %s62_s8  ;;  %p68_p2 = scmp.lt.s32.totalorder %s62_s8, %s62_s8 }
   0x6   :  { %p69_p3 = por %p68_p2, %p67_p1 }
   0x8   :  { %p70_p4 = pnand %p69_p3, %p63_p0 }
   0xa   :  { %73 = shalt.err (!%p70_p4)
}
   0xb   :  { %17 = dma.hbm_to_vmem [thread:$0]  %s116_s0, 256, %s15_s7, [#allocation3]  }
   0xc   :  { %94 = dma.done.wait [#allocation3], 256  }
   0xd   :  { %95 = vsyncadd [#allocation3], 4294967040  ;;  %v21_v0 = vld [vmem:[#allocation2] sm:$0xff]  ;;  %v22_v1 = vld [vmem:[#allocation2 + $0x8] sm:$0xff]  ;;  %s99_s11 = smov [#allocation5]  }
   0xe   :  { %v23_v2 = vmul.f32 0.5, %v21_v0  ;;  %v24_v3 = vmul.f32 0.5, %v22_v1  ;;  %s39_s12 = sshll.u32 %s99_s11, 4  ;;  %s40_s12 = int_to_ptr.vmem [resolvable:$true] %s39_s12 }
   0xf   :  { %s74_s0 = scalar_lea.vmem %s40_s12, 256  ;;  %p79_p6 = scmp.lt.s32.totalorder %s40_s12, %s40_s12 }
  0x10   :  { %50 = vtanh.f32 %v23_v2  ;;  %p75_p5 = scmp.ne.s32.totalorder %s40_s12, %s74_s0  ;;  %p80_p7 = scmp.lt.s32.totalorder %s74_s0, %s74_s0 }
  0x11   :  { %52 = vtanh.f32 %v24_v3 }
  0x12   :  { %p81_p8 = por %p80_p7, %p79_p6 }
  0x14   :  { %p82_p9 = pnand %p81_p8, %p75_p5 }
  0x1d   :  { %v51_v4 = vpop.eup %50 }
  0x1e   :  { %v53_v5 = vpop.eup %52  ;;  %v27_v6 = vmul.f32 6.0, %v51_v4 }
  0x1f   :  { %v28_v7 = vmul.f32 6.0, %v53_v5 }
  0x20   :  { %v29_v8 = vadd.f32 6.0, %v27_v6 }
  0x21   :  { %v30_v9 = vadd.f32 6.0, %v28_v7 }
  0x22   :  { %31 = vst [vmem:[#allocation5] sm:$0xff] %v29_v8 }
  0x23   :  { %32 = vst [vmem:[#allocation5 + $0x8] sm:$0xff] %v30_v9 }
  0x24   :  { %85 = shalt.err (!%p82_p9)
}
  0x25   :  { %42 = dma.vmem_to_hbm [thread:$0]  %s40_s12, 256, %s117_s1, [#allocation4]  }
  0x26   :  { %96 = dma.done.wait [#allocation4], 256  }
  0x27   :  { %97 = vsyncadd [#allocation4], 4294967040 }
  0x28   :  { %46 = vsyncpa [#allocation3], 1 }
  0x29   :  { %47 = vsyncpa [#allocation4], 1 }

</bundles_post_ra>
